<compile_context>
chip_gen: v7x
topology: tpu7x:2x2x1
jax: 0.10.0
libtpu: 0.0.40
codegen_flags: <defaults>
</compile_context>

<pallas_src>
import functools
import math

import jax
import jax.numpy as jnp
from jax import lax
from jax.experimental import pallas as pl
from jax.experimental.pallas import tpu as pltpu


def _round_up(x, m):
    return ((x + m - 1) // m) * m


def _cdiv(a, b):
    return -(-a // b)


def _fa_mlp_kernel(*refs, out_scale, drop_threshold, apply_dropout, tile_n):
    if apply_dropout:
        seed_ref, x_ref, w1_ref, w2_ref, o_ref = refs
    else:
        x_ref, w1_ref, w2_ref, o_ref = refs

    # Layer 1 (MXU): contract over D_in with W1 in its natural (H, D_in) layout.
    # Result is (H, TILE_N) -> lane-dense along the batch dimension.
    hidden = lax.dot_general(
        w1_ref[...], x_ref[...],
        dimension_numbers=(((1,), (1,)), ((), ())),
        preferred_element_type=jnp.float32)          # (H, TILE_N)
    hidden = jnp.maximum(hidden, 0.0)                # ReLU

    if apply_dropout:
        # Stateless counter-based hash of (global row, global col, seed):
        # deterministic, independent of tile_n, no TPU-only PRNG primitives.
        shape = hidden.shape
        col = lax.broadcasted_iota(jnp.int32, shape, 1) + pl.program_id(0) * tile_n
        row = lax.broadcasted_iota(jnp.int32, shape, 0)
        u = (col.astype(jnp.uint32) * jnp.uint32(0x9E3779B1)
             + row.astype(jnp.uint32) * jnp.uint32(0x85EBCA77)
             + seed_ref[0].astype(jnp.uint32))
        # murmur3 fmix32 finalizer
        u = u ^ (u >> 16)
        u = u * jnp.uint32(0x85EBCA6B)
        u = u ^ (u >> 13)
        u = u * jnp.uint32(0xC2B2AE35)
        u = u ^ (u >> 16)
        keep = u >= jnp.uint32(drop_threshold)       # P(drop) = threshold / 2^32
        # NOTE: 1/keep_prob is folded into out_scale (layer 2 is linear).
        hidden = jnp.where(keep, hidden, 0.0)

    # Layer 2 (MXU): (1, H) @ (H, TILE_N) -> lane-dense (1, TILE_N).
    out = jnp.dot(w2_ref[...], hidden, preferred_element_type=jnp.float32)
    o_ref[...] = (out * out_scale).astype(o_ref.dtype)


def two_layer_fa_forward(x, w1, w2, *, dropout_prob=0.0, training=False,
                         seed=0, tile_n=2048):
    """x: (N, D_in), w1: (H, D_in), w2: (1, H)  ->  (N, 1)."""
    n, d_in = x.shape
    h = w1.shape[0]
    assert w1.shape == (h, d_in), w1.shape
    assert w2.shape == (1, h), w2.shape
    assert 0.0 <= float(dropout_prob) < 1.0

    # --- batch tiling ------------------------------------------------------
    # Lane-dense output blocks need TILE_N % 128 == 0.  Use few, large tiles
    # (step-count bound at these shapes), but keep >= 2 tiles when possible so
    # both v7x TensorCores get work; padding stays < num_tiles * 128 rows.
    n_128 = _round_up(n, 128)
    req = max(128, _round_up(min(int(tile_n), n_128), 128))
    num_tiles = _cdiv(n_128, req)
    if n_128 >= 256:
        num_tiles = max(num_tiles, 2)
    tile = _round_up(_cdiv(n_128, num_tiles), 128)
    num_tiles = _cdiv(n_128, tile)
    n_pad = num_tiles * tile

    x_p = x if n_pad == n else jnp.pad(x, ((0, n_pad - n), (0, 0)))

    keep_prob = 1.0 - float(dropout_prob)
    apply_dropout = bool(training)
    drop_threshold = min(int(round(float(dropout_prob) * (1 << 32))), (1 << 32) - 1)
    out_scale = (1.0 / math.sqrt(h)) * (1.0 / keep_prob if apply_dropout else 1.0)

    kernel = functools.partial(
        _fa_mlp_kernel,
        out_scale=out_scale,
        drop_threshold=drop_threshold,
        apply_dropout=apply_dropout,
        tile_n=tile,
    )

    # --- specs / args ------------------------------------------------------
    in_specs = []
    args = []
    if apply_dropout:
        in_specs.append(pl.BlockSpec(memory_space=pltpu.MemorySpace.SMEM))  # seed
        args.append(jnp.asarray([seed], dtype=jnp.int32))
    in_specs += [
        pl.BlockSpec((tile, d_in), lambda i: (i, 0)),   # X batch tiles (streamed)
        pl.BlockSpec((h, d_in), lambda i: (0, 0)),      # W1, resident
        pl.BlockSpec((1, h), lambda i: (0, 0)),         # W2, resident
    ]
    args += [x_p, w1, w2]
    out_spec = pl.BlockSpec((1, tile), lambda i: (0, i))  # lane-dense output

    # --- VMEM budget from (8,128)-padded tile sizes -------------------------
    f32 = 4
    d_pad = _round_up(d_in, 128)
    h_lane = _round_up(h, 128)
    h_sub = _round_up(h, 8)
    vmem_need = f32 * (
        2 * tile * d_pad          # double-buffered X tiles
        + 2 * h_sub * d_pad       # W1 buffers
        + 2 * 8 * h_lane          # W2 buffers
        + 2 * 8 * tile            # output buffers
        + h_sub * tile)           # hidden intermediate
    vmem_limit = int(min(max(2 * vmem_need, 8 << 20), 48 << 20))

    flops = 2 * n_pad * d_in * h + 2 * n_pad * h
    bytes_accessed = (n_pad * d_in + h * d_in + h + n_pad) * f32

    out_padded = pl.pallas_call(
        kernel,
        out_shape=jax.ShapeDtypeStruct((1, n_pad), x.dtype),
        grid_spec=pl.GridSpec(
            grid=(num_tiles,),
            in_specs=in_specs,
            out_specs=out_spec,
        ),
        compiler_params=pltpu.CompilerParams(
            dimension_semantics=("parallel",),
            vmem_limit_bytes=vmem_limit,
        ),
        cost_estimate=pl.CostEstimate(
            flops=flops, transcendentals=0, bytes_accessed=bytes_accessed),
    )(*args)

    return out_padded[0, :n].reshape(n, 1)


if __name__ == "__main__":
    # Shapes consistent with the module: input_features=16, hidden_features=32,
    # output=1.  N=500 exercises the multi-tile batch grid plus padding.
    N, D_IN, H = 500, 16, 32
    DROPOUT_P = 0.5

    key = jax.random.PRNGKey(0)
    kx, k1, k2 = jax.random.split(key, 3)
    x = jax.random.normal(kx, (N, D_IN), dtype=jnp.float32)
    w1 = jax.random.uniform(
        k1, (H, D_IN), dtype=jnp.float32,
        minval=-1.0 / math.sqrt(D_IN), maxval=1.0 / math.sqrt(D_IN))
    w2 = jax.random.uniform(
        k2, (1, H), dtype=jnp.float32,
        minval=-1.0 / math.sqrt(H), maxval=1.0 / math.sqrt(H))

    # Pure-JAX reference (eval-mode forward: dropout is identity).
    hidden_ref = jnp.maximum(
        jnp.dot(x, w1.T, precision=lax.Precision.HIGHEST), 0.0)
    ref = jnp.dot(hidden_ref, w2.T,
                  precision=lax.Precision.HIGHEST) / math.sqrt(H)

    # 1) Eval-mode forward (dropout = identity).
    out_eval = two_layer_fa_forward(
        x, w1, w2, dropout_prob=DROPOUT_P, training=False)
    jax.block_until_ready(out_eval)
    assert out_eval.shape == (N, 1), out_eval.shape
    assert jnp.allclose(out_eval, ref, atol=1e-3, rtol=1e-3), "eval mismatch"

    # 2) Training mode with p=0.0 exercises the in-kernel dropout/hash path
    #    while remaining exactly comparable to the reference.
    out_train_p0 = two_layer_fa_forward(
        x, w1, w2, dropout_prob=0.0, training=True, seed=123)
    jax.block_until_ready(out_train_p0)
    assert jnp.allclose(out_train_p0, ref, atol=1e-3, rtol=1e-3), "train p=0 mismatch"

    # 3) Training mode with p=0.5: deterministic w.r.t. the seed, finite, and
    #    the mask is tiling-invariant (same output across different tile_n).
    out_t1 = two_layer_fa_forward(
        x, w1, w2, dropout_prob=DROPOUT_P, training=True, seed=7, tile_n=256)
    out_t2 = two_layer_fa_forward(
        x, w1, w2, dropout_prob=DROPOUT_P, training=True, seed=7, tile_n=256)
    out_t3 = two_layer_fa_forward(
        x, w1, w2, dropout_prob=DROPOUT_P, training=True, seed=7, tile_n=128)
    jax.block_until_ready(out_t1)
    jax.block_until_ready(out_t2)
    jax.block_until_ready(out_t3)
    assert out_t1.shape == (N, 1), out_t1.shape
    assert bool(jnp.all(jnp.isfinite(out_t1))), "non-finite train output"
    assert bool(jnp.array_equal(out_t1, out_t2)), "train output not deterministic"
    assert jnp.allclose(out_t1, out_t3, atol=0.0, rtol=0.0), "mask not tiling-invariant"

    print("KERNEL_OK")
</pallas_src>

<mosaic_0001>
module attributes {stable_mosaic.version = 11 : i64} {
  func.func @_fa_mlp_kernel(%arg0: i32, %arg1: memref<256x16xf32, #tpu.memory_space<vmem>>, %arg2: memref<32x16xf32, #tpu.memory_space<vmem>>, %arg3: memref<1x32xf32, #tpu.memory_space<vmem>>, %arg4: memref<1x256xf32, #tpu.memory_space<vmem>>) attributes {dimension_semantics = [#tpu.dimension_semantics<parallel>], iteration_bounds = array<i64: 2>, scalar_prefetch = 0 : i64, scratch_operands = 0 : i64, tpu.core_type = #tpu.core_type<tc>, window_params = [{transform_indices = @transform_0, window_bounds = array<i64: 256, 16>}, {pipeline_mode = #tpu.pipeline_mode<synchronous>, transform_indices = @transform_1, window_bounds = array<i64: 32, 16>}, {pipeline_mode = #tpu.pipeline_mode<synchronous>, transform_indices = @transform_2, window_bounds = array<i64: 1, 32>}, {transform_indices = @transform_3, window_bounds = array<i64: 1, 256>}]} {
    %c0 = arith.constant 0 : index
    %c0_0 = arith.constant 0 : index
    %0 = vector.load %arg2[%c0, %c0_0] : memref<32x16xf32, #tpu.memory_space<vmem>>, vector<32x16xf32>
    %c0_1 = arith.constant 0 : index
    %c0_2 = arith.constant 0 : index
    %1 = vector.load %arg1[%c0_1, %c0_2] : memref<256x16xf32, #tpu.memory_space<vmem>>, vector<256x16xf32>
    %cst = arith.constant dense<0.000000e+00> : vector<32x256xf32>
    %2 = tpu.matmul %0, %1, %cst {dimension_numbers = #tpu.dot_dimension_numbers<[1], [1], [0], [0], [0, 0, 1, 0], [], []>} : vector<32x16xf32>, vector<256x16xf32>, vector<32x256xf32> -> vector<32x256xf32>
    %cst_3 = arith.constant 0.000000e+00 : f32
    %3 = vector.broadcast %cst_3 : f32 to vector<32x256xf32>
    %4 = arith.maximumf %2, %3 : vector<32x256xf32>
    %c0_4 = arith.constant 0 : index
    %c0_5 = arith.constant 0 : index
    %5 = vector.load %arg3[%c0_4, %c0_5] : memref<1x32xf32, #tpu.memory_space<vmem>>, vector<1x32xf32>
    %cst_6 = arith.constant dense<0.000000e+00> : vector<1x256xf32>
    %6 = tpu.matmul %5, %4, %cst_6 {dimension_numbers = #tpu.dot_dimension_numbers<[1], [0], [0], [1], [0, 0, 1, 1], [], []>} : vector<1x32xf32>, vector<32x256xf32>, vector<1x256xf32> -> vector<1x256xf32>
    %cst_7 = arith.constant 0.176776692 : f32
    %7 = vector.broadcast %cst_7 : f32 to vector<1x256xf32>
    %8 = arith.mulf %6, %7 : vector<1x256xf32>
    %c0_8 = arith.constant 0 : index
    %c0_9 = arith.constant 0 : index
    %9 = vector.load %arg4[%c0_8, %c0_9] : memref<1x256xf32, #tpu.memory_space<vmem>>, vector<1x256xf32>
    tpu.vector_store %arg4[%c0_8, %c0_9], %8 {strides = array<i32>} : memref<1x256xf32, #tpu.memory_space<vmem>>, vector<1x256xf32>,
    return
  }
  func.func @transform_0(%arg0: i32) -> (i32, i32) {
    %c0_i32 = arith.constant 0 : i32
    %c0_i32_0 = arith.constant 0 : i32
    return %arg0, %c0_i32 : i32, i32
  }
  func.func @transform_1(%arg0: i32) -> (i32, i32) {
    %c0_i32 = arith.constant 0 : i32
    %c0_i32_0 = arith.constant 0 : i32
    %c0_i32_1 = arith.constant 0 : i32
    return %c0_i32, %c0_i32_0 : i32, i32
  }
  func.func @transform_2(%arg0: i32) -> (i32, i32) {
    %c0_i32 = arith.constant 0 : i32
    %c0_i32_0 = arith.constant 0 : i32
    %c0_i32_1 = arith.constant 0 : i32
    return %c0_i32, %c0_i32_0 : i32, i32
  }
  func.func @transform_3(%arg0: i32) -> (i32, i32) {
    %c0_i32 = arith.constant 0 : i32
    %c0_i32_0 = arith.constant 0 : i32
    return %c0_i32, %arg0 : i32, i32
  }
}

</mosaic_0001>

<bundles_post_ra>
// kernel: tpu_custom_call.1
= control target key start
LH: loop header
LB: loop body
LE: loop exit
PB: predicated region body
PF: predicated region fallthrough
CT: control target
= control target key end

     0   :  { %8 = vsyncpa [#allocation3], 0  ;;  %s1061_s0 = inlined_call_operand.vmem [shape: f32[512,16], index: 0, kind: input, shape index: {}]   ;;  %s1062_s1 = inlined_call_operand.vmem [shape: f32[32,16], index: 1, kind: input, shape index: {}]   ;;  %s1063_s2 = inlined_call_operand.vmem [shape: f32[1,32], index: 2, kind: input, shape index: {}]   ;;  %s1064_s3 = inlined_call_operand.hbm [shape: f32[1,512], index: 3, kind: output, shape index: {}]  }
   0x1   :  { %10 = vsyncpa [#allocation3 + $0x1], 0  ;;  %s863_s12 = smov 0   ;;  %s865_s13 = smov 0  }
   0x2   :  { %s867_s14 = smov 0   ;;  %s869_s15 = smov 0  }
   0x3 LB: > { %s588_s16 = sadd.s32 4294967295, %s838_s15   ;;  %s589_s17 = sadd.s32 4294967294, %s838_s15   ;;  %s838_s15 = sphi %s869_s15, %s1072_s15   ;;  %s834_s14 = sphi %s867_s14, %s1071_s14   ;;  %s830_s13 = sphi %s865_s13, %s1070_s13   ;;  %s826_s12 = sphi %s863_s12, %s1069_s12  }
   0x4   : > { %s886_s18 = sadd.s32 1, %s838_s15   ;;  %s91_s19 = sadd.s32 1, %s834_s14 }
   0x5   : > { %s88_s20 = ssub.s32 %s838_s15, %s886_s18  ;;  %p101_p0 = scmp.ne.s32.totalorder %s834_s14, %s830_s13 }
   0x6   : > { %p89_p1 = scmp.eq.s32.totalorder %s88_s20, 0  ;;  %p102_p2 = scmp.eq.s32.totalorder %s588_s16, 1 }
   0x7   : > { %p107_p3 = scmp.ne.s32.totalorder %s830_s13, %s826_s12  ;;  %p108_p4 = scmp.eq.s32.totalorder %s589_s17, 1 }
   0x8   : > { %s896_s21 = scalar_select %p89_p1, %s834_s14, %s91_s19  }
   0x9   : > { %p898_p5 = por %p102_p2, %p101_p0  ;;  %p902_p6 = por %p108_p4, %p107_p3 }
   0xa   : > { %p592_p7 = scmp.ge.s32.totalorder %s838_s15, 1  ;;  %p141_p8 = scmp.lt.s32.totalorder %s838_s15, 3 }
   0xc   : > { %p142_p9 = pnand %p592_p7, %p141_p8 }
   0xd   : > { %s908_s24 = sshll.u32 (!%p142_p9), %s588_s16, 5  ;;  %vm208_vm0 = vcmask (!%p142_p9), 130048   ;;  %v913_v0 = vld [vmem:[%s1062_s1] sm:$0xff] (!%p142_p9)  ;;  %v173_v50 = vld [vmem:[%s1062_s1 + $0x8] sm:$0xff] (!%p142_p9)  ;;  %v174_v51 = vld [vmem:[%s1062_s1 + $0x10] sm:$0xff] (!%p142_p9)  ;;  %v840_v53 = vmov (!%p142_p9), 0.0  }
   0xe   : > { %145 = sbr.rel (%p142_p9) target bundleno = 560 (0x230), region = 32  ;;  %p166_p10 = scmp.lt.s32.totalorder (!%p142_p9), %s908_s24, 63  ;;  %671 = vmatprep.mubr.msk.f32.mxu0 (!%p142_p9), %vm208_vm0, %v913_v0  ;;  %vm926_vm1 = vmpackc.low (!%p142_p9), %vm208_vm0, %vm208_vm0  ;;  %v175_v52 = vld [vmem:[%s1062_s1 + $0x18] sm:$0xff] (!%p142_p9)  ;;  %483 = vmatprep.mubr.f32.mxu1 (!%p142_p9), %v840_v53  ;;  %vm415_vm2 = vcmask (!%p142_p9), 261120  }
   0xf   : > { %s162_s17 = sand.u32 (!%p142_p9), 1, %s830_s13  }
  0x10   : > { %s593_s19 = sshll.u32 (!%p142_p9), %s162_s17, 1  ;;  %s516_s29 = scalar_lea.sflag (!%p142_p9), [#allocation3], %s162_s17 }
  0x11   : > { %s164_s20 = scalar_lea.vmem (!%p142_p9), [#allocation2], %s593_s19 }
  0x12   : > { %s530_s25 = sshll.u32 (!%p142_p9), %s164_s20, 4  ;;  %s1021_s25 = int_to_ptr.vmem [resolvable:$true] %s530_s25 }
  0x13   : > { %s776_s30 = scalar_lea.vmem (!%p142_p9), %s1021_s25, 32 }
  0x14   : > { %p777_p11 = scmp.ne.s32.totalorder (!%p142_p9), %s1021_s25, %s776_s30 }
  0x15   : > { %s167_s27 = scalar_select %p166_p10, %s908_s24, 63 }
  0x16   : > { %p778_p12 = pnand %p777_p11, %p898_p5 }
  0x17   : > { %s595_s28 = sshll.u32 %s167_s27, 3 }
  0x18   : > { %s922_s4 = scalar_lea.vmem %s1061_s0, %s595_s28  ;;  %s1019_s28 = scalar_lea.hbm %s1064_s3, %s908_s24 }
  0x19   : > { %v192_v2 = vld [vmem:[%s922_s4 + $0x80] sm:$0xff]  ;;  %v193_v3 = vld [vmem:[%s922_s4 + $0x88] sm:$0xff]  ;;  %v194_v7 = vld [vmem:[%s922_s4 + $0x90] sm:$0xff]  ;;  %p779_p13 = pneg %p778_p12 }
  0x1a   : > { %v176_v4 = vld [vmem:[%s922_s4] sm:$0xff]  ;;  %v679_v5 = vpack.c.bf16 %v193_v3, %v192_v2  ;;  %v177_v6 = vld [vmem:[%s922_s4 + $0x8] sm:$0xff]  ;;  %v195_v8 = vld [vmem:[%s922_s4 + $0x98] sm:$0xff] }
  0x1b   : > { %v682_v9 = vpack.c.bf16 %v177_v6, %v176_v4  ;;  %v685_v10 = vpack.c.bf16 %v195_v8, %v194_v7  ;;  %v178_v11 = vld [vmem:[%s922_s4 + $0x10] sm:$0xff]  ;;  %v179_v12 = vld [vmem:[%s922_s4 + $0x18] sm:$0xff]  ;;  %v196_v13 = vld [vmem:[%s922_s4 + $0xa0] sm:$0xff] }
  0x1c   : > { %681 = vmatprep.subr.msk.bf16.mxu0 %vm926_vm1, %v679_v5  ;;  %v197_v14 = vld [vmem:[%s922_s4 + $0xa8] sm:$0xff]  ;;  %v688_v15 = vpack.c.bf16 %v179_v12, %v178_v11  ;;  %v180_v17 = vld [vmem:[%s922_s4 + $0x20] sm:$0xff]  ;;  %v198_v19 = vld [vmem:[%s922_s4 + $0xb0] sm:$0xff]  ;;  %v841_v11 = vmov 1966171168  }
  0x1d   : > { %684 = vmatpush3.bf16.xpose.msk.msra.mxu0 %vm926_vm1, %v682_v9  ;;  %v691_v16 = vpack.c.bf16 %v197_v14, %v196_v13  ;;  %v181_v18 = vld [vmem:[%s922_s4 + $0x28] sm:$0xff]  ;;  %v199_v20 = vld [vmem:[%s922_s4 + $0xb8] sm:$0xff]  ;;  %v182_v23 = vld [vmem:[%s922_s4 + $0x30] sm:$0xff]  ;;  %v496_v12 = vunpack.c.l.s4 %v841_v11  ;;  %v498_v13 = vlaneseq }
  0x1e   : > { %687 = vmatprep.subr.msk.bf16.mxu0 %vm926_vm1, %v685_v10  ;;  %v694_v21 = vpack.c.bf16 %v181_v18, %v180_v17  ;;  %v697_v22 = vpack.c.bf16 %v199_v20, %v198_v19  ;;  %v183_v24 = vld [vmem:[%s922_s4 + $0x38] sm:$0xff]  ;;  %v200_v25 = vld [vmem:[%s922_s4 + $0xc0] sm:$0xff]  ;;  %v201_v26 = vld [vmem:[%s922_s4 + $0xc8] sm:$0xff] }
  0x1f   : > { %v700_v27 = vpack.c.bf16 %v183_v24, %v182_v23  ;;  %v703_v28 = vpack.c.bf16 %v201_v26, %v200_v25  ;;  %v184_v29 = vld [vmem:[%s922_s4 + $0x40] sm:$0xff]  ;;  %v185_v30 = vld [vmem:[%s922_s4 + $0x48] sm:$0xff]  ;;  %v202_v31 = vld [vmem:[%s922_s4 + $0xd0] sm:$0xff]  ;;  %v497_v14 = vunpack.c.0.s8 %v496_v12  ;;  %vm512_vm3 = vcmp.lt.s32.totalorder %v498_v13, 256 }
  0x20   : > { %v203_v32 = vld [vmem:[%s922_s4 + $0xd8] sm:$0xff]  ;;  %v706_v33 = vpack.c.bf16 %v185_v30, %v184_v29  ;;  %v186_v35 = vld [vmem:[%s922_s4 + $0x50] sm:$0xff]  ;;  %v204_v37 = vld [vmem:[%s922_s4 + $0xe0] sm:$0xff] }
  0x21   : > { %v709_v34 = vpack.c.bf16 %v203_v32, %v202_v31  ;;  %v187_v36 = vld [vmem:[%s922_s4 + $0x58] sm:$0xff]  ;;  %v205_v38 = vld [vmem:[%s922_s4 + $0xe8] sm:$0xff]  ;;  %v188_v41 = vld [vmem:[%s922_s4 + $0x60] sm:$0xff] }
  0x22   : > { %v712_v39 = vpack.c.bf16 %v187_v36, %v186_v35  ;;  %v715_v40 = vpack.c.bf16 %v205_v38, %v204_v37  ;;  %v189_v42 = vld [vmem:[%s922_s4 + $0x68] sm:$0xff]  ;;  %v206_v43 = vld [vmem:[%s922_s4 + $0xf0] sm:$0xff]  ;;  %v207_v44 = vld [vmem:[%s922_s4 + $0xf8] sm:$0xff] }
  0x23   : > { %v718_v45 = vpack.c.bf16 %v189_v42, %v188_v41  ;;  %v721_v46 = vpack.c.bf16 %v207_v44, %v206_v43  ;;  %v190_v47 = vld [vmem:[%s922_s4 + $0x70] sm:$0xff]  ;;  %v191_v48 = vld [vmem:[%s922_s4 + $0x78] sm:$0xff]  ;;  %v414_v10 = vld [vmem:[%s1063_s2] sm:$0x1]  ;;  %s842_s4 = smov [#allocation2]  }
  0x24   : > { %v724_v49 = vpack.c.bf16 %v191_v48, %v190_v47  ;;  %s780_s5 = sshll.u32 %s842_s4, 4  ;;  %s781_s5 = int_to_ptr.vmem [resolvable:$false] %s780_s5 }
  0x25   : > { %690 = vmatpush3.bf16.xpose.msk.msra.mxu0 %vm926_vm1, %v688_v15  ;;  %v499_v15 = vshrl.u32 %v498_v13, 7  ;;  %s782_s6 = scalar_lea.vmem %s781_s5, 64  ;;  %p783_p0 = scmp.lt.s32.totalorder %s1021_s25, %s781_s5 }
  0x26   : > { %693 = vmatprep.subr.msk.bf16.mxu0 %vm926_vm1, %v691_v16  ;;  %p784_p1 = scmp.lt.s32.totalorder %s782_s6, %s776_s30 }
  0x27   : > { %v500_v20 = vsub.s32 %v497_v14, %v499_v15 }
  0x28   : > { %p785_p2 = por %p784_p1, %p783_p0 }
  0x2a   : > { %p786_p3 = pnand %p785_p2, %p779_p13 }
  0x2d   : > { %696 = vmatpush3.bf16.xpose.msk.msra.mxu0 %vm926_vm1, %v694_v21 }
  0x2e   : > { %699 = vmatprep.subr.msk.bf16.mxu0 %vm926_vm1, %v697_v22 }
  0x35   : > { %702 = vmatpush3.bf16.xpose.msk.msra.mxu0 %vm926_vm1, %v700_v27 }
  0x36   : > { %705 = vmatprep.subr.msk.bf16.mxu0 %vm926_vm1, %v703_v28 }
  0x3d   : > { %708 = vmatpush3.bf16.xpose.msk.msra.mxu0 %vm926_vm1, %v706_v33 }
  0x3e   : > { %711 = vmatprep.subr.msk.bf16.mxu0 %vm926_vm1, %v709_v34 }
  0x45   : > { %714 = vmatpush3.bf16.xpose.msk.msra.mxu0 %vm926_vm1, %v712_v39 }
  0x46   : > { %717 = vmatprep.subr.msk.bf16.mxu0 %vm926_vm1, %v715_v40 }
  0x4d   : > { %720 = vmatpush3.bf16.xpose.msk.msra.mxu0 %vm926_vm1, %v718_v45 }
  0x4e   : > { %723 = vmatprep.subr.msk.bf16.mxu0 %vm926_vm1, %v721_v46 }
  0x55   : > { %726 = vmatpush3.bf16.xpose.msk.msra.mxu0 %vm926_vm1, %v724_v49 }
  0x5c   : > { %672 = vmatmul.mubr.msk.f32.vlgmr.msra.gmra.mrb[0].mxu0 %vm208_vm0, %v913_v0 }
  0x5d   : > { %673 = vmatprep.mubr.msk.f32.mxu0 %vm208_vm0, %v173_v50 }
  0x60   : > { %674 = vmatmul.mubr.msk.f32.gmra.mrb[2].mxu0 %vm208_vm0, %v173_v50 }
  0x61   : > { %675 = vmatprep.mubr.msk.f32.mxu0 %vm208_vm0, %v174_v51 }
  0x64   : > { %676 = vmatmul.mubr.msk.f32.gmra.mrb[4].mxu0 %vm208_vm0, %v174_v51 }
  0x65   : > { %677 = vmatprep.mubr.msk.f32.mxu0 %vm208_vm0, %v175_v52 }
  0x68   : > { %678 = vmatmul.mubr.msk.f32.gmra.mrb[6].mxu0 %vm208_vm0, %v175_v52 }
 0x12f   : > { %v383_v54 = vpop.f32.mrb[0].mxu0 }
 0x130   : > { %v385_v55 = vpop.f32.mrb[1].mxu0  ;;  %v406_v57 = vmax.f32 %v383_v54, 0.0 }
 0x131   : > { %v407_v60 = vmax.f32 %v385_v55, 0.0 }
 0x133   : > { %v389_v56 = vpop.f32.mrb[2].mxu0 }
 0x134   : > { %v408_v58 = vmax.f32 %v389_v56, 0.0  ;;  %v391_v59 = vpop.f32.mrb[3].mxu0 }
 0x135   : > { %v409_v61 = vmax.f32 %v391_v59, 0.0 }
 0x136   : > { %v729_v62 = vpack.c.bf16 %v408_v58, %v406_v57 }
 0x137   : > { %v395_v63 = vpop.f32.mrb[4].mxu0  ;;  %v727_v0 = vpack.c.bf16 %v409_v61, %v407_v60 }
 0x138   : > { %v397_v1 = vpop.f32.mrb[5].mxu0  ;;  %v410_v3 = vmax.f32 %v395_v63, 0.0 }
 0x139   : > { %728 = vmatprep.subr.bf16.mxu1 %v727_v0  ;;  %v411_v6 = vmax.f32 %v397_v1, 0.0 }
 0x13a   : > { %730 = vmatpush1.bf16.msra.mxu1 %v729_v62 }
 0x13b   : > { %v401_v2 = vpop.f32.mrb[6].mxu0 }
 0x13c   : > { %v412_v4 = vmax.f32 %v401_v2, 0.0  ;;  %v403_v5 = vpop.f32.mrb[7].mxu0 }
 0x13d   : > { %v413_v7 = vmax.f32 %v403_v5, 0.0 }
 0x13e   : > { %v733_v8 = vpack.c.bf16 %v412_v4, %v410_v3 }
 0x13f   : > { %v731_v9 = vpack.c.bf16 %v413_v7, %v411_v6 }
 0x141   : > { %732 = vmatprep.subr.bf16.mxu1 %v731_v9 }
 0x142   : > { %734 = vmatpush1.bf16.msra.mxu1 %v733_v8 }
 0x145   : > { %632 = vmatmul.mubr.msk.f32.vlgmr.msra.gmra.mrb[0].mxu1 %vm415_vm2, %v414_v10 }
 0x218   : > { %v485_v16 = vpop.f32.mrb[0].mxu1 }
 0x219   : > { %v490_v17 = vmul.f32 0.17677669, %v485_v16  ;;  %v487_v18 = vpop.f32.mrb[1].mxu1 }
 0x21a   : > { %v491_v19 = vmul.f32 0.17677669, %v487_v18 }
 0x21c   : > { %v494_v21 = vcombine.low %v490_v17, %v491_v19 }
 0x21e   : > { %v501_v22 = vrot.slane %v494_v21, %v500_v20 }
 0x220   : > { %v508_v23 = vrot.slane %v501_v22, %v500_v20 }
 0x222   : > { %514 = vst.msk [vmem:[%s164_s20] sm:$0x3] %vm512_vm3, %v508_v23 }
 0x223   : > { %789 = shalt.err (!%p786_p3)
}
 0x224   : > { %s790_s24 = scalar_lea.hbm %s1019_s28, 32  ;;  %s794_s9 = scalar_lea.hbm %s1064_s3, 64 }
 0x225   : > { %p791_p4 = scmp.ne.s32.totalorder %s1019_s28, %s790_s24  ;;  %p795_p9 = scmp.lt.u32.totalorder %s1019_s28, %s1064_s3 }
 0x226   : > { %p796_p10 = scmp.lt.u32.totalorder %s794_s9, %s790_s24  ;;  %p798_p12 = scmp.lt.u32.totalorder %s790_s24, %s1019_s28 }
 0x227   : > { %p792_p7 = pnand %p791_p4, %p898_p5 }
 0x228   : > { %p797_p11 = por %p796_p10, %p795_p9 }
 0x229   : > { %p793_p8 = pneg %p792_p7 }
 0x22a   : > { %p799_p13 = por %p798_p12, %p797_p11 }
 0x22c   : > { %p800_p0 = pnand %p799_p13, %p793_p8 }
 0x22e   : > { %803 = shalt.err (!%p800_p0)
}
 0x22f   : > { %735 = dma.vmem_to_hbm [thread:$0]  (%p898_p5), %s1021_s25, 32, %s1019_s28, %s516_s29  }
 0x230 PF: > { %p741_p1 = scmp.ge.s32.totalorder %s838_s15, 2  ;;  %s542_s16 = sand.u32 1, %s826_s12  }
 0x231   : > { %s543_s17 = scalar_lea.sflag [#allocation3], %s542_s16 }
 0x232   : > { %p738_p2 = pnand %p741_p1, %p902_p6 }
 0x234   : > { %821 = dma.done.wait (!%p738_p2), %s543_s17, 32  }
 0x235   : > { %823 = vsyncadd (!%p738_p2), %s543_s17, 4294967264  ;;  %p13_p3 = scmp.ge.s32.totalorder %s886_s18, 4   ;;  %s1069_s12 = smov %s830_s13 }
 0x236   : > { %s1070_s13 = smov %s834_s14  ;;  %s1071_s14 = smov %s896_s21 }
 0x237   : > { %s1072_s15 = smov %s886_s18  ;;  %15 = sbr.rel (!%p13_p3) target bundleno = 3 (0x3), region = 67 }
 0x23e   :  { %548 = vsyncpa [#allocation3], 1 }
 0x23f   :  { %550 = vsyncpa [#allocation3 + $0x1], 1 }

</bundles_post_ra>
